<compile_context>
chip_gen: v7x
topology: tpu7x:2x2x1
jax: 0.10.0
libtpu: 0.0.40
codegen_flags: <defaults>
</compile_context>

<pallas_src>
import functools

import jax
import jax.numpy as jnp
from jax import lax
from jax.experimental import pallas as pl
from jax.experimental.pallas import tpu as pltpu


def _round_up(x: int, m: int) -> int:
    return ((x + m - 1) // m) * m


def ca_layer_kernel(x_ref, wt_ref, w1_ref, b1_ref, w2t_ref, b2_ref, o_ref,
                    xfp_ref, col_ref, *, W: int, NB: int, OFF: int, TAIL: int):
    # x_ref:   (NB, C, H*W)  input images; channels on sublanes, pixels on lanes
    # wt_ref:  (C, 9*C)      conv1 weight: wt[cout, (ky*3+kx)*C + cin]
    # w1_ref:  (C, C8)       SE squeeze 1x1 weight;  b1_ref: (1, C8)
    # w2t_ref: (C, C8)       SE excite  1x1 weight (transposed);  b2_ref: (C, 1)
    # o_ref:   (NB, C, H*W)
    # xfp_ref: VMEM (C, OFF + H*W + TAIL)  flat zero-margined halo staging buffer
    # col_ref: VMEM (9*C, NB*H*W)          im2col slab (contraction dim on sublanes)
    C = x_ref.shape[1]
    HW = x_ref.shape[2]

    # ---- hoisted constants (computed once per grid step) --------------------
    col_idx = lax.broadcasted_iota(jnp.int32, (1, HW), 1)
    w_idx = col_idx % W
    not_left = jnp.broadcast_to(w_idx >= 1, (C, HW))       # tap looks 1 px left
    not_right = jnp.broadcast_to(w_idx <= W - 2, (C, HW))  # tap looks 1 px right
    wt = wt_ref[...].astype(jnp.float32)
    w1 = w1_ref[...].astype(jnp.float32)
    w2t = w2t_ref[...].astype(jnp.float32)
    b1 = b1_ref[...].astype(jnp.float32)
    b2 = b2_ref[...].astype(jnp.float32)
    inv_hw = 1.0 / HW

    # Zero only the halo margins; the interior is overwritten per image below.
    # (Re-done every step so the kernel stays correct under megacore sharding.)
    xfp_ref[:, :OFF] = jnp.zeros((C, OFF), jnp.float32)
    xfp_ref[:, OFF + HW:] = jnp.zeros((C, TAIL), jnp.float32)

    # ---- im2col: 9 shifted copies per image, stacked into one slab ----------
    # Per-image staging keeps the vertical (+/-W) taps from bleeding across
    # image boundaries; out-of-image rows fall into the zeroed margins and the
    # left/right wrap is killed by the lane masks.
    for nb in range(NB):
        xfp_ref[:, OFF:OFF + HW] = x_ref[nb].astype(jnp.float32)
        for ky in range(3):
            for kx in range(3):
                tap = ky * 3 + kx
                d = (ky - 1) * W + (kx - 1)
                win = xfp_ref[:, OFF + d:OFF + d + HW]       # (C, HW)
                if kx == 0:
                    win = jnp.where(not_left, win, 0.0)
                elif kx == 2:
                    win = jnp.where(not_right, win, 0.0)
                col_ref[tap * C:(tap + 1) * C, nb * HW:(nb + 1) * HW] = win

    # conv3x3 (no bias) + ReLU for all NB images in ONE MXU matmul:
    # (C, 9C) @ (9C, NB*HW), f32 accumulation.
    t2_all = jnp.maximum(
        jnp.dot(wt, col_ref[...], preferred_element_type=jnp.float32), 0.0)

    # ---- per-image squeeze-excite + residual ---------------------------------
    # The two 1x1 convs are width-1 GEMVs; do them on the VPU/XLU (multiply +
    # reduce) instead of paying two MXU fill/drain round-trips per image.
    for nb in range(NB):
        t2 = t2_all[:, nb * HW:(nb + 1) * HW]                         # (C, HW)
        pooled = jnp.sum(t2, axis=1, keepdims=True) * inv_hw          # (C, 1)
        # h1[0, c8] = relu(sum_c w1[c, c8] * pooled[c] + b1[c8])
        h1 = jnp.maximum(
            jnp.sum(w1 * pooled, axis=0, keepdims=True) + b1, 0.0)    # (1, C8)
        # logits[c, 0] = sum_c8 w2[c8, c] * h1[c8] + b2[c]
        logits = jnp.sum(w2t * h1, axis=1, keepdims=True) + b2        # (C, 1)
        y = jax.nn.sigmoid(logits)                                    # (C, 1)

        x = x_ref[nb].astype(jnp.float32)                             # (C, HW)
        # out = x + t2 * y  (per-channel scale broadcast along lanes; dense store)
        o_ref[nb] = (x + t2 * y).astype(o_ref.dtype)


def ca_layer(x_nchw, wconv, w1, b1, w2, b2):
    """CALayer forward.

    x_nchw: (N, C, H, W) float32 (PyTorch NCHW layout).
    wconv:  (3, 3, C, C) HWIO 3x3 conv weight (conv1, no bias).
    w1: (C, C//8), b1: (C//8,)   -- ca[0] 1x1 conv (h1 = pooled @ w1 + b1)
    w2: (C//8, C), b2: (C,)      -- ca[2] 1x1 conv (y  = sigmoid(h1 @ w2 + b2))
    """
    N, C, H, W = x_nchw.shape
    C8 = w1.shape[1]
    HW = H * W
    # 128-aligned margins, each at least W+1 wide, so every 3x3 tap is a static
    # in-bounds lane-offset slice of the flat staging buffer.
    OFF = _round_up(W + 1, 128)
    TAIL = _round_up(W + 1, 128)

    # Images per grid step: fewer, wider steps amortize the ~0.35us per-step
    # overhead and the MXU fill; only batch when per-image lane slices stay
    # 128-aligned.  TODO(synk): on v7x keep >=2 grid steps when N is large.
    NB = 2 if (N % 2 == 0 and HW % 128 == 0) else 1

    x_flat = x_nchw.reshape(N, C, HW)            # free reshape: pixels -> lanes
    wt = wconv.reshape(9 * C, C).T               # (C, 9C): wt[cout, tap*C + cin]
    w2t = w2.T                                   # (C, C8)
    b1r = b1.reshape(1, C8)
    b2c = b2.reshape(C, 1)

    kernel = functools.partial(ca_layer_kernel, W=W, NB=NB, OFF=OFF, TAIL=TAIL)

    out_flat = pl.pallas_call(
        kernel,
        out_shape=jax.ShapeDtypeStruct((N, C, HW), x_nchw.dtype),
        grid_spec=pltpu.PrefetchScalarGridSpec(
            num_scalar_prefetch=0,
            grid=(N // NB,),
            in_specs=[
                pl.BlockSpec((NB, C, HW), lambda b: (b, 0, 0)),
                pl.BlockSpec((C, 9 * C), lambda b: (0, 0)),
                pl.BlockSpec((C, C8), lambda b: (0, 0)),
                pl.BlockSpec((1, C8), lambda b: (0, 0)),
                pl.BlockSpec((C, C8), lambda b: (0, 0)),
                pl.BlockSpec((C, 1), lambda b: (0, 0)),
            ],
            out_specs=pl.BlockSpec((NB, C, HW), lambda b: (b, 0, 0)),
            scratch_shapes=[
                pltpu.VMEM((C, OFF + HW + TAIL), jnp.float32),   # halo staging
                pltpu.VMEM((9 * C, NB * HW), jnp.float32),       # im2col slab
            ],
        ),
        compiler_params=pltpu.CompilerParams(
            dimension_semantics=("parallel",),        # batch steps independent
            vmem_limit_bytes=32 * 1024 * 1024,        # explicit; safe on all gens
        ),
    )(x_flat, wt, w1, b1r, w2t, b2c)
    return out_flat.reshape(N, C, H, W)


def ca_layer_ref(x_nchw, wconv, w1, b1, w2, b2):
    """Pure-JAX reference matching the PyTorch forward (NCHW)."""
    t1 = lax.conv_general_dilated(
        x_nchw, wconv, window_strides=(1, 1), padding=((1, 1), (1, 1)),
        dimension_numbers=("NCHW", "HWIO", "NCHW"))
    t2 = jnp.maximum(t1, 0.0)
    pooled = jnp.mean(t2, axis=(2, 3), keepdims=True)                 # (N, C, 1, 1)
    h1 = jnp.maximum(jnp.einsum("nchw,cd->ndhw", pooled, w1)
                     + b1.reshape(1, -1, 1, 1), 0.0)
    y = jax.nn.sigmoid(jnp.einsum("ndhw,dc->nchw", h1, w2)
                       + b2.reshape(1, -1, 1, 1))
    return x_nchw + t2 * y


if __name__ == "__main__":
    # Small shapes consistent with the module (channel must be divisible by 8).
    N, C, H, W = 2, 16, 16, 16
    C8 = C // 8

    key = jax.random.PRNGKey(0)
    kx_, kc, k1, kb1, k2, kb2 = jax.random.split(key, 6)

    x = jax.random.normal(kx_, (N, C, H, W), jnp.float32)
    # Deterministic synthetic parameters (roughly Kaiming-scaled).
    wconv = jax.random.normal(kc, (3, 3, C, C), jnp.float32) * (1.0 / (3 * 3 * C)) ** 0.5
    w1 = jax.random.normal(k1, (C, C8), jnp.float32) * (1.0 / C) ** 0.5
    b1 = jax.random.normal(kb1, (C8,), jnp.float32) * 0.1
    w2 = jax.random.normal(k2, (C8, C), jnp.float32) * (1.0 / C8) ** 0.5
    b2 = jax.random.normal(kb2, (C,), jnp.float32) * 0.1

    out = jax.block_until_ready(ca_layer(x, wconv, w1, b1, w2, b2))
    ref = jax.block_until_ready(ca_layer_ref(x, wconv, w1, b1, w2, b2))

    assert out.shape == (N, C, H, W)
    max_err = float(jnp.max(jnp.abs(out - ref)))
    assert jnp.allclose(out, ref, atol=1e-4, rtol=1e-4), max_err

    print("KERNEL_OK")
</pallas_src>

<mosaic_0001>
module attributes {stable_mosaic.version = 11 : i64} {
  func.func @ca_layer_kernel(%arg0: i32, %arg1: memref<2x16x256xf32, #tpu.memory_space<vmem>>, %arg2: memref<16x144xf32, #tpu.memory_space<vmem>>, %arg3: memref<16x2xf32, #tpu.memory_space<vmem>>, %arg4: memref<1x2xf32, #tpu.memory_space<vmem>>, %arg5: memref<16x2xf32, #tpu.memory_space<vmem>>, %arg6: memref<16x1xf32, #tpu.memory_space<vmem>>, %arg7: memref<2x16x256xf32, #tpu.memory_space<vmem>>, %arg8: memref<16x512xf32, #tpu.memory_space<vmem>>, %arg9: memref<144x512xf32, #tpu.memory_space<vmem>>) attributes {dimension_semantics = [#tpu.dimension_semantics<parallel>], iteration_bounds = array<i64: 1>, scalar_prefetch = 0 : i64, scratch_operands = 2 : i64, tpu.core_type = #tpu.core_type<tc>, window_params = [{transform_indices = @transform_0, window_bounds = array<i64: 2, 16, 256>}, {pipeline_mode = #tpu.pipeline_mode<synchronous>, transform_indices = @transform_1, window_bounds = array<i64: 16, 144>}, {pipeline_mode = #tpu.pipeline_mode<synchronous>, transform_indices = @transform_2, window_bounds = array<i64: 16, 2>}, {pipeline_mode = #tpu.pipeline_mode<synchronous>, transform_indices = @transform_3, window_bounds = array<i64: 1, 2>}, {pipeline_mode = #tpu.pipeline_mode<synchronous>, transform_indices = @transform_4, window_bounds = array<i64: 16, 2>}, {pipeline_mode = #tpu.pipeline_mode<synchronous>, transform_indices = @transform_5, window_bounds = array<i64: 16, 1>}, {transform_indices = @transform_6, window_bounds = array<i64: 2, 16, 256>}]} {
    %0 = tpu.iota {dimensions = array<i32: 1>} : vector<1x256xi32>
    %c16_i32 = arith.constant 16 : i32
    %c0_i32 = arith.constant 0 : i32
    %1 = arith.cmpi eq, %c16_i32, %c0_i32 : i32
    %c1_i32 = arith.constant 1 : i32
    %2 = arith.select %1, %c1_i32, %c16_i32 : i32
    %3 = vector.broadcast %2 : i32 to vector<1x256xi32>
    %4 = arith.remsi %0, %3 : vector<1x256xi32>
    %c0_i32_0 = arith.constant 0 : i32
    %5 = vector.broadcast %c0_i32_0 : i32 to vector<1x256xi32>
    %6 = arith.cmpi ne, %4, %5 : vector<1x256xi32>
    %c0_i32_1 = arith.constant 0 : i32
    %7 = vector.broadcast %c0_i32_1 : i32 to vector<1x256xi32>
    %8 = arith.cmpi slt, %4, %7 : vector<1x256xi32>
    %c0_i32_2 = arith.constant 0 : i32
    %9 = arith.cmpi slt, %2, %c0_i32_2 : i32
    %10 = vector.broadcast %9 : i1 to vector<1x256xi1>
    %11 = vector.broadcast %10 : vector<1x256xi1> to vector<1x256xi1>
    %12 = arith.xori %8, %11 : vector<1x256xi1>
    %13 = arith.andi %12, %6 : vector<1x256xi1>
    %14 = vector.broadcast %2 : i32 to vector<1x256xi32>
    %15 = arith.addi %4, %14 : vector<1x256xi32>
    %16 = arith.select %13, %15, %4 : vector<1x256xi1>, vector<1x256xi32>
    %c1_i32_3 = arith.constant 1 : i32
    %17 = vector.broadcast %c1_i32_3 : i32 to vector<1x256xi32>
    %18 = arith.cmpi sge, %16, %17 : vector<1x256xi32>
    %19 = vector.shape_cast %18 : vector<1x256xi1> to vector<1x256xi1>
    %20 = vector.broadcast %19 : vector<1x256xi1> to vector<16x256xi1>
    %c14_i32 = arith.constant 14 : i32
    %21 = vector.broadcast %c14_i32 : i32 to vector<1x256xi32>
    %22 = arith.cmpi sle, %16, %21 : vector<1x256xi32>
    %23 = vector.shape_cast %22 : vector<1x256xi1> to vector<1x256xi1>
    %24 = vector.broadcast %23 : vector<1x256xi1> to vector<16x256xi1>
    %c0 = arith.constant 0 : index
    %c0_4 = arith.constant 0 : index
    %25 = vector.load %arg2[%c0, %c0_4] : memref<16x144xf32, #tpu.memory_space<vmem>>, vector<16x144xf32>
    %c0_5 = arith.constant 0 : index
    %c0_6 = arith.constant 0 : index
    %26 = vector.load %arg3[%c0_5, %c0_6] : memref<16x2xf32, #tpu.memory_space<vmem>>, vector<16x2xf32>
    %c0_7 = arith.constant 0 : index
    %c0_8 = arith.constant 0 : index
    %27 = vector.load %arg5[%c0_7, %c0_8] : memref<16x2xf32, #tpu.memory_space<vmem>>, vector<16x2xf32>
    %c0_9 = arith.constant 0 : index
    %c0_10 = arith.constant 0 : index
    %28 = vector.load %arg4[%c0_9, %c0_10] : memref<1x2xf32, #tpu.memory_space<vmem>>, vector<1x2xf32>
    %c0_11 = arith.constant 0 : index
    %c0_12 = arith.constant 0 : index
    %29 = vector.load %arg6[%c0_11, %c0_12] : memref<16x1xf32, #tpu.memory_space<vmem>>, vector<16x1xf32>
    %cst = arith.constant 0.000000e+00 : f32
    %30 = vector.broadcast %cst : f32 to vector<16x128xf32>
    %c0_13 = arith.constant 0 : index
    %c0_14 = arith.constant 0 : index
    %31 = vector.load %arg8[%c0_13, %c0_14] : memref<16x512xf32, #tpu.memory_space<vmem>>, vector<16x128xf32>
    tpu.vector_store %arg8[%c0_13, %c0_14], %30 {strides = array<i32>} : memref<16x512xf32, #tpu.memory_space<vmem>>, vector<16x128xf32>,
    %cst_15 = arith.constant 0.000000e+00 : f32
    %32 = vector.broadcast %cst_15 : f32 to vector<16x128xf32>
    %c0_16 = arith.constant 0 : index
    %c384 = arith.constant 384 : index
    %33 = vector.load %arg8[%c0_16, %c384] : memref<16x512xf32, #tpu.memory_space<vmem>>, vector<16x128xf32>
    tpu.vector_store %arg8[%c0_16, %c384], %32 {strides = array<i32>} : memref<16x512xf32, #tpu.memory_space<vmem>>, vector<16x128xf32>,
    %c0_17 = arith.constant 0 : index
    %c0_18 = arith.constant 0 : index
    %c0_19 = arith.constant 0 : index
    %34 = vector.load %arg1[%c0_17, %c0_18, %c0_19] : memref<2x16x256xf32, #tpu.memory_space<vmem>>, vector<1x16x256xf32>
    %35 = vector.shape_cast %34 : vector<1x16x256xf32> to vector<16x256xf32>
    %c0_20 = arith.constant 0 : index
    %c128 = arith.constant 128 : index
    %36 = vector.load %arg8[%c0_20, %c128] : memref<16x512xf32, #tpu.memory_space<vmem>>, vector<16x256xf32>
    tpu.vector_store %arg8[%c0_20, %c128], %35 {strides = array<i32>} : memref<16x512xf32, #tpu.memory_space<vmem>>, vector<16x256xf32>,
    %c0_21 = arith.constant 0 : index
    %c111 = arith.constant 111 : index
    %37 = vector.load %arg8[%c0_21, %c111] : memref<16x512xf32, #tpu.memory_space<vmem>>, vector<16x256xf32>
    %cst_22 = arith.constant 0.000000e+00 : f32
    %38 = vector.broadcast %cst_22 : f32 to vector<16x256xf32>
    %39 = arith.select %20, %37, %38 : vector<16x256xi1>, vector<16x256xf32>
    %c0_23 = arith.constant 0 : index
    %c0_24 = arith.constant 0 : index
    %40 = vector.load %arg9[%c0_23, %c0_24] : memref<144x512xf32, #tpu.memory_space<vmem>>, vector<16x256xf32>
    tpu.vector_store %arg9[%c0_23, %c0_24], %39 {strides = array<i32>} : memref<144x512xf32, #tpu.memory_space<vmem>>, vector<16x256xf32>,
    %c0_25 = arith.constant 0 : index
    %c112 = arith.constant 112 : index
    %41 = vector.load %arg8[%c0_25, %c112] : memref<16x512xf32, #tpu.memory_space<vmem>>, vector<16x256xf32>
    %c16 = arith.constant 16 : index
    %c0_26 = arith.constant 0 : index
    %42 = vector.load %arg9[%c16, %c0_26] : memref<144x512xf32, #tpu.memory_space<vmem>>, vector<16x256xf32>
    tpu.vector_store %arg9[%c16, %c0_26], %41 {strides = array<i32>} : memref<144x512xf32, #tpu.memory_space<vmem>>, vector<16x256xf32>,
    %c0_27 = arith.constant 0 : index
    %c113 = arith.constant 113 : index
    %43 = vector.load %arg8[%c0_27, %c113] : memref<16x512xf32, #tpu.memory_space<vmem>>, vector<16x256xf32>
    %cst_28 = arith.constant 0.000000e+00 : f32
    %44 = vector.broadcast %cst_28 : f32 to vector<16x256xf32>
    %45 = arith.select %24, %43, %44 : vector<16x256xi1>, vector<16x256xf32>
    %c32 = arith.constant 32 : index
    %c0_29 = arith.constant 0 : index
    %46 = vector.load %arg9[%c32, %c0_29] : memref<144x512xf32, #tpu.memory_space<vmem>>, vector<16x256xf32>
    tpu.vector_store %arg9[%c32, %c0_29], %45 {strides = array<i32>} : memref<144x512xf32, #tpu.memory_space<vmem>>, vector<16x256xf32>,
    %c0_30 = arith.constant 0 : index
    %c127 = arith.constant 127 : index
    %47 = vector.load %arg8[%c0_30, %c127] : memref<16x512xf32, #tpu.memory_space<vmem>>, vector<16x256xf32>
    %cst_31 = arith.constant 0.000000e+00 : f32
    %48 = vector.broadcast %cst_31 : f32 to vector<16x256xf32>
    %49 = arith.select %20, %47, %48 : vector<16x256xi1>, vector<16x256xf32>
    %c48 = arith.constant 48 : index
    %c0_32 = arith.constant 0 : index
    %50 = vector.load %arg9[%c48, %c0_32] : memref<144x512xf32, #tpu.memory_space<vmem>>, vector<16x256xf32>
    tpu.vector_store %arg9[%c48, %c0_32], %49 {strides = array<i32>} : memref<144x512xf32, #tpu.memory_space<vmem>>, vector<16x256xf32>,
    %c0_33 = arith.constant 0 : index
    %c128_34 = arith.constant 128 : index
    %51 = vector.load %arg8[%c0_33, %c128_34] : memref<16x512xf32, #tpu.memory_space<vmem>>, vector<16x256xf32>
    %c64 = arith.constant 64 : index
    %c0_35 = arith.constant 0 : index
    %52 = vector.load %arg9[%c64, %c0_35] : memref<144x512xf32, #tpu.memory_space<vmem>>, vector<16x256xf32>
    tpu.vector_store %arg9[%c64, %c0_35], %51 {strides = array<i32>} : memref<144x512xf32, #tpu.memory_space<vmem>>, vector<16x256xf32>,
    %c0_36 = arith.constant 0 : index
    %c129 = arith.constant 129 : index
    %53 = vector.load %arg8[%c0_36, %c129] : memref<16x512xf32, #tpu.memory_space<vmem>>, vector<16x256xf32>
    %cst_37 = arith.constant 0.000000e+00 : f32
    %54 = vector.broadcast %cst_37 : f32 to vector<16x256xf32>
    %55 = arith.select %24, %53, %54 : vector<16x256xi1>, vector<16x256xf32>
    %c80 = arith.constant 80 : index
    %c0_38 = arith.constant 0 : index
    %56 = vector.load %arg9[%c80, %c0_38] : memref<144x512xf32, #tpu.memory_space<vmem>>, vector<16x256xf32>
    tpu.vector_store %arg9[%c80, %c0_38], %55 {strides = array<i32>} : memref<144x512xf32, #tpu.memory_space<vmem>>, vector<16x256xf32>,
    %c0_39 = arith.constant 0 : index
    %c143 = arith.constant 143 : index
    %57 = vector.load %arg8[%c0_39, %c143] : memref<16x512xf32, #tpu.memory_space<vmem>>, vector<16x256xf32>
    %cst_40 = arith.constant 0.000000e+00 : f32
    %58 = vector.broadcast %cst_40 : f32 to vector<16x256xf32>
    %59 = arith.select %20, %57, %58 : vector<16x256xi1>, vector<16x256xf32>
    %c96 = arith.constant 96 : index
    %c0_41 = arith.constant 0 : index
    %60 = vector.load %arg9[%c96, %c0_41] : memref<144x512xf32, #tpu.memory_space<vmem>>, vector<16x256xf32>
    tpu.vector_store %arg9[%c96, %c0_41], %59 {strides = array<i32>} : memref<144x512xf32, #tpu.memory_space<vmem>>, vector<16x256xf32>,
    %c0_42 = arith.constant 0 : index
    %c144 = arith.constant 144 : index
    %61 = vector.load %arg8[%c0_42, %c144] : memref<16x512xf32, #tpu.memory_space<vmem>>, vector<16x256xf32>
    %c112_43 = arith.constant 112 : index
    %c0_44 = arith.constant 0 : index
    %62 = vector.load %arg9[%c112_43, %c0_44] : memref<144x512xf32, #tpu.memory_space<vmem>>, vector<16x256xf32>
    tpu.vector_store %arg9[%c112_43, %c0_44], %61 {strides = array<i32>} : memref<144x512xf32, #tpu.memory_space<vmem>>, vector<16x256xf32>,
    %c0_45 = arith.constant 0 : index
    %c145 = arith.constant 145 : index
    %63 = vector.load %arg8[%c0_45, %c145] : memref<16x512xf32, #tpu.memory_space<vmem>>, vector<16x256xf32>
    %cst_46 = arith.constant 0.000000e+00 : f32
    %64 = vector.broadcast %cst_46 : f32 to vector<16x256xf32>
    %65 = arith.select %24, %63, %64 : vector<16x256xi1>, vector<16x256xf32>
    %c128_47 = arith.constant 128 : index
    %c0_48 = arith.constant 0 : index
    %66 = vector.load %arg9[%c128_47, %c0_48] : memref<144x512xf32, #tpu.memory_space<vmem>>, vector<16x256xf32>
    tpu.vector_store %arg9[%c128_47, %c0_48], %65 {strides = array<i32>} : memref<144x512xf32, #tpu.memory_space<vmem>>, vector<16x256xf32>,
    %c1 = arith.constant 1 : index
    %c0_49 = arith.constant 0 : index
    %c0_50 = arith.constant 0 : index
    %67 = vector.load %arg1[%c1, %c0_49, %c0_50] : memref<2x16x256xf32, #tpu.memory_space<vmem>>, vector<1x16x256xf32>
    %68 = vector.shape_cast %67 : vector<1x16x256xf32> to vector<16x256xf32>
    %c0_51 = arith.constant 0 : index
    %c128_52 = arith.constant 128 : index
    %69 = vector.load %arg8[%c0_51, %c128_52] : memref<16x512xf32, #tpu.memory_space<vmem>>, vector<16x256xf32>
    tpu.vector_store %arg8[%c0_51, %c128_52], %68 {strides = array<i32>} : memref<16x512xf32, #tpu.memory_space<vmem>>, vector<16x256xf32>,
    %c0_53 = arith.constant 0 : index
    %c111_54 = arith.constant 111 : index
    %70 = vector.load %arg8[%c0_53, %c111_54] : memref<16x512xf32, #tpu.memory_space<vmem>>, vector<16x256xf32>
    %cst_55 = arith.constant 0.000000e+00 : f32
    %71 = vector.broadcast %cst_55 : f32 to vector<16x256xf32>
    %72 = arith.select %20, %70, %71 : vector<16x256xi1>, vector<16x256xf32>
    %c0_56 = arith.constant 0 : index
    %c256 = arith.constant 256 : index
    %73 = vector.load %arg9[%c0_56, %c256] : memref<144x512xf32, #tpu.memory_space<vmem>>, vector<16x256xf32>
    tpu.vector_store %arg9[%c0_56, %c256], %72 {strides = array<i32>} : memref<144x512xf32, #tpu.memory_space<vmem>>, vector<16x256xf32>,
    %c0_57 = arith.constant 0 : index
    %c112_58 = arith.constant 112 : index
    %74 = vector.load %arg8[%c0_57, %c112_58] : memref<16x512xf32, #tpu.memory_space<vmem>>, vector<16x256xf32>
    %c16_59 = arith.constant 16 : index
    %c256_60 = arith.constant 256 : index
    %75 = vector.load %arg9[%c16_59, %c256_60] : memref<144x512xf32, #tpu.memory_space<vmem>>, vector<16x256xf32>
    tpu.vector_store %arg9[%c16_59, %c256_60], %74 {strides = array<i32>} : memref<144x512xf32, #tpu.memory_space<vmem>>, vector<16x256xf32>,
    %c0_61 = arith.constant 0 : index
    %c113_62 = arith.constant 113 : index
    %76 = vector.load %arg8[%c0_61, %c113_62] : memref<16x512xf32, #tpu.memory_space<vmem>>, vector<16x256xf32>
    %cst_63 = arith.constant 0.000000e+00 : f32
    %77 = vector.broadcast %cst_63 : f32 to vector<16x256xf32>
    %78 = arith.select %24, %76, %77 : vector<16x256xi1>, vector<16x256xf32>
    %c32_64 = arith.constant 32 : index
    %c256_65 = arith.constant 256 : index
    %79 = vector.load %arg9[%c32_64, %c256_65] : memref<144x512xf32, #tpu.memory_space<vmem>>, vector<16x256xf32>
    tpu.vector_store %arg9[%c32_64, %c256_65], %78 {strides = array<i32>} : memref<144x512xf32, #tpu.memory_space<vmem>>, vector<16x256xf32>,
    %c0_66 = arith.constant 0 : index
    %c127_67 = arith.constant 127 : index
    %80 = vector.load %arg8[%c0_66, %c127_67] : memref<16x512xf32, #tpu.memory_space<vmem>>, vector<16x256xf32>
    %cst_68 = arith.constant 0.000000e+00 : f32
    %81 = vector.broadcast %cst_68 : f32 to vector<16x256xf32>
    %82 = arith.select %20, %80, %81 : vector<16x256xi1>, vector<16x256xf32>
    %c48_69 = arith.constant 48 : index
    %c256_70 = arith.constant 256 : index
    %83 = vector.load %arg9[%c48_69, %c256_70] : memref<144x512xf32, #tpu.memory_space<vmem>>, vector<16x256xf32>
    tpu.vector_store %arg9[%c48_69, %c256_70], %82 {strides = array<i32>} : memref<144x512xf32, #tpu.memory_space<vmem>>, vector<16x256xf32>,
    %c0_71 = arith.constant 0 : index
    %c128_72 = arith.constant 128 : index
    %84 = vector.load %arg8[%c0_71, %c128_72] : memref<16x512xf32, #tpu.memory_space<vmem>>, vector<16x256xf32>
    %c64_73 = arith.constant 64 : index
    %c256_74 = arith.constant 256 : index
    %85 = vector.load %arg9[%c64_73, %c256_74] : memref<144x512xf32, #tpu.memory_space<vmem>>, vector<16x256xf32>
    tpu.vector_store %arg9[%c64_73, %c256_74], %84 {strides = array<i32>} : memref<144x512xf32, #tpu.memory_space<vmem>>, vector<16x256xf32>,
    %c0_75 = arith.constant 0 : index
    %c129_76 = arith.constant 129 : index
    %86 = vector.load %arg8[%c0_75, %c129_76] : memref<16x512xf32, #tpu.memory_space<vmem>>, vector<16x256xf32>
    %cst_77 = arith.constant 0.000000e+00 : f32
    %87 = vector.broadcast %cst_77 : f32 to vector<16x256xf32>
    %88 = arith.select %24, %86, %87 : vector<16x256xi1>, vector<16x256xf32>
    %c80_78 = arith.constant 80 : index
    %c256_79 = arith.constant 256 : index
    %89 = vector.load %arg9[%c80_78, %c256_79] : memref<144x512xf32, #tpu.memory_space<vmem>>, vector<16x256xf32>
    tpu.vector_store %arg9[%c80_78, %c256_79], %88 {strides = array<i32>} : memref<144x512xf32, #tpu.memory_space<vmem>>, vector<16x256xf32>,
    %c0_80 = arith.constant 0 : index
    %c143_81 = arith.constant 143 : index
    %90 = vector.load %arg8[%c0_80, %c143_81] : memref<16x512xf32, #tpu.memory_space<vmem>>, vector<16x256xf32>
    %cst_82 = arith.constant 0.000000e+00 : f32
    %91 = vector.broadcast %cst_82 : f32 to vector<16x256xf32>
    %92 = arith.select %20, %90, %91 : vector<16x256xi1>, vector<16x256xf32>
    %c96_83 = arith.constant 96 : index
    %c256_84 = arith.constant 256 : index
    %93 = vector.load %arg9[%c96_83, %c256_84] : memref<144x512xf32, #tpu.memory_space<vmem>>, vector<16x256xf32>
    tpu.vector_store %arg9[%c96_83, %c256_84], %92 {strides = array<i32>} : memref<144x512xf32, #tpu.memory_space<vmem>>, vector<16x256xf32>,
    %c0_85 = arith.constant 0 : index
    %c144_86 = arith.constant 144 : index
    %94 = vector.load %arg8[%c0_85, %c144_86] : memref<16x512xf32, #tpu.memory_space<vmem>>, vector<16x256xf32>
    %c112_87 = arith.constant 112 : index
    %c256_88 = arith.constant 256 : index
    %95 = vector.load %arg9[%c112_87, %c256_88] : memref<144x512xf32, #tpu.memory_space<vmem>>, vector<16x256xf32>
    tpu.vector_store %arg9[%c112_87, %c256_88], %94 {strides = array<i32>} : memref<144x512xf32, #tpu.memory_space<vmem>>, vector<16x256xf32>,
    %c0_89 = arith.constant 0 : index
    %c145_90 = arith.constant 145 : index
    %96 = vector.load %arg8[%c0_89, %c145_90] : memref<16x512xf32, #tpu.memory_space<vmem>>, vector<16x256xf32>
    %cst_91 = arith.constant 0.000000e+00 : f32
    %97 = vector.broadcast %cst_91 : f32 to vector<16x256xf32>
    %98 = arith.select %24, %96, %97 : vector<16x256xi1>, vector<16x256xf32>
    %c128_92 = arith.constant 128 : index
    %c256_93 = arith.constant 256 : index
    %99 = vector.load %arg9[%c128_92, %c256_93] : memref<144x512xf32, #tpu.memory_space<vmem>>, vector<16x256xf32>
    tpu.vector_store %arg9[%c128_92, %c256_93], %98 {strides = array<i32>} : memref<144x512xf32, #tpu.memory_space<vmem>>, vector<16x256xf32>,
    %c0_94 = arith.constant 0 : index
    %c0_95 = arith.constant 0 : index
    %100 = vector.load %arg9[%c0_94, %c0_95] : memref<144x512xf32, #tpu.memory_space<vmem>>, vector<144x512xf32>
    %cst_96 = arith.constant dense<0.000000e+00> : vector<16x512xf32>
    %101 = tpu.matmul %25, %100, %cst_96 {dimension_numbers = #tpu.dot_dimension_numbers<[1], [0], [0], [1], [0, 0, 1, 1], [], []>} : vector<16x144xf32>, vector<144x512xf32>, vector<16x512xf32> -> vector<16x512xf32>
    %cst_97 = arith.constant 0.000000e+00 : f32
    %102 = vector.broadcast %cst_97 : f32 to vector<16x512xf32>
    %103 = arith.maximumf %101, %102 : vector<16x512xf32>
    %104 = vector.extract_strided_slice %103 {offsets = [0, 0], sizes = [16, 256], strides = [1, 1]} : vector<16x512xf32> to vector<16x256xf32>
    %cst_98 = arith.constant dense<0.000000e+00> : vector<16xf32>
    %105 = vector.multi_reduction <add>, %104, %cst_98 [1] : vector<16x256xf32> to vector<16xf32>
    %106 = vector.shape_cast %105 : vector<16xf32> to vector<16x1xf32>
    %cst_99 = arith.constant 3.906250e-03 : f32
    %107 = vector.broadcast %cst_99 : f32 to vector<16x1xf32>
    %108 = arith.mulf %106, %107 : vector<16x1xf32>
    %109 = vector.broadcast %108 : vector<16x1xf32> to vector<16x2xf32>
    %110 = arith.mulf %26, %109 : vector<16x2xf32>
    %cst_100 = arith.constant dense<0.000000e+00> : vector<2xf32>
    %111 = vector.multi_reduction <add>, %110, %cst_100 [0] : vector<16x2xf32> to vector<2xf32>
    %112 = vector.shape_cast %111 : vector<2xf32> to vector<1x2xf32>
    %113 = arith.addf %112, %28 : vector<1x2xf32>
    %cst_101 = arith.constant 0.000000e+00 : f32
    %114 = vector.broadcast %cst_101 : f32 to vector<1x2xf32>
    %115 = arith.maximumf %113, %114 : vector<1x2xf32>
    %116 = vector.broadcast %115 : vector<1x2xf32> to vector<16x2xf32>
    %117 = arith.mulf %27, %116 : vector<16x2xf32>
    %cst_102 = arith.constant dense<0.000000e+00> : vector<16xf32>
    %118 = vector.multi_reduction <add>, %117, %cst_102 [1] : vector<16x2xf32> to vector<16xf32>
    %119 = vector.shape_cast %118 : vector<16xf32> to vector<16x1xf32>
    %120 = arith.addf %119, %29 : vector<16x1xf32>
    %121 = arith.negf %120 : vector<16x1xf32>
    %122 = math.exp %121 : vector<16x1xf32>
    %cst_103 = arith.constant 1.000000e+00 : f32
    %123 = vector.broadcast %cst_103 : f32 to vector<16x1xf32>
    %124 = arith.addf %123, %122 : vector<16x1xf32>
    %125 = arith.divf %123, %124 : vector<16x1xf32>
    %c0_104 = arith.constant 0 : index
    %c0_105 = arith.constant 0 : index
    %c0_106 = arith.constant 0 : index
    %126 = vector.load %arg1[%c0_104, %c0_105, %c0_106] : memref<2x16x256xf32, #tpu.memory_space<vmem>>, vector<1x16x256xf32>
    %127 = vector.shape_cast %126 : vector<1x16x256xf32> to vector<16x256xf32>
    %128 = vector.broadcast %125 : vector<16x1xf32> to vector<16x256xf32>
    %129 = arith.mulf %104, %128 : vector<16x256xf32>
    %130 = arith.addf %127, %129 : vector<16x256xf32>
    %c0_107 = arith.constant 0 : index
    %c0_108 = arith.constant 0 : index
    %c0_109 = arith.constant 0 : index
    %131 = vector.load %arg7[%c0_107, %c0_108, %c0_109] : memref<2x16x256xf32, #tpu.memory_space<vmem>>, vector<1x16x256xf32>
    %132 = vector.shape_cast %131 : vector<1x16x256xf32> to vector<16x256xf32>
    %133 = vector.shape_cast %130 : vector<16x256xf32> to vector<1x16x256xf32>
    tpu.vector_store %arg7[%c0_107, %c0_108, %c0_109], %133 {strides = array<i32>} : memref<2x16x256xf32, #tpu.memory_space<vmem>>, vector<1x16x256xf32>,
    %134 = vector.extract_strided_slice %103 {offsets = [0, 256], sizes = [16, 256], strides = [1, 1]} : vector<16x512xf32> to vector<16x256xf32>
    %cst_110 = arith.constant dense<0.000000e+00> : vector<16xf32>
    %135 = vector.multi_reduction <add>, %134, %cst_110 [1] : vector<16x256xf32> to vector<16xf32>
    %136 = vector.shape_cast %135 : vector<16xf32> to vector<16x1xf32>
    %cst_111 = arith.constant 3.906250e-03 : f32
    %137 = vector.broadcast %cst_111 : f32 to vector<16x1xf32>
    %138 = arith.mulf %136, %137 : vector<16x1xf32>
    %139 = vector.broadcast %138 : vector<16x1xf32> to vector<16x2xf32>
    %140 = arith.mulf %26, %139 : vector<16x2xf32>
    %cst_112 = arith.constant dense<0.000000e+00> : vector<2xf32>
    %141 = vector.multi_reduction <add>, %140, %cst_112 [0] : vector<16x2xf32> to vector<2xf32>
    %142 = vector.shape_cast %141 : vector<2xf32> to vector<1x2xf32>
    %143 = arith.addf %142, %28 : vector<1x2xf32>
    %cst_113 = arith.constant 0.000000e+00 : f32
    %144 = vector.broadcast %cst_113 : f32 to vector<1x2xf32>
    %145 = arith.maximumf %143, %144 : vector<1x2xf32>
    %146 = vector.broadcast %145 : vector<1x2xf32> to vector<16x2xf32>
    %147 = arith.mulf %27, %146 : vector<16x2xf32>
    %cst_114 = arith.constant dense<0.000000e+00> : vector<16xf32>
    %148 = vector.multi_reduction <add>, %147, %cst_114 [1] : vector<16x2xf32> to vector<16xf32>
    %149 = vector.shape_cast %148 : vector<16xf32> to vector<16x1xf32>
    %150 = arith.addf %149, %29 : vector<16x1xf32>
    %151 = arith.negf %150 : vector<16x1xf32>
    %152 = math.exp %151 : vector<16x1xf32>
    %cst_115 = arith.constant 1.000000e+00 : f32
    %153 = vector.broadcast %cst_115 : f32 to vector<16x1xf32>
    %154 = arith.addf %153, %152 : vector<16x1xf32>
    %155 = arith.divf %153, %154 : vector<16x1xf32>
    %c1_116 = arith.constant 1 : index
    %c0_117 = arith.constant 0 : index
    %c0_118 = arith.constant 0 : index
    %156 = vector.load %arg1[%c1_116, %c0_117, %c0_118] : memref<2x16x256xf32, #tpu.memory_space<vmem>>, vector<1x16x256xf32>
    %157 = vector.shape_cast %156 : vector<1x16x256xf32> to vector<16x256xf32>
    %158 = vector.broadcast %155 : vector<16x1xf32> to vector<16x256xf32>
    %159 = arith.mulf %134, %158 : vector<16x256xf32>
    %160 = arith.addf %157, %159 : vector<16x256xf32>
    %c1_119 = arith.constant 1 : index
    %c0_120 = arith.constant 0 : index
    %c0_121 = arith.constant 0 : index
    %161 = vector.load %arg7[%c1_119, %c0_120, %c0_121] : memref<2x16x256xf32, #tpu.memory_space<vmem>>, vector<1x16x256xf32>
    %162 = vector.shape_cast %161 : vector<1x16x256xf32> to vector<16x256xf32>
    %163 = vector.shape_cast %160 : vector<16x256xf32> to vector<1x16x256xf32>
    tpu.vector_store %arg7[%c1_119, %c0_120, %c0_121], %163 {strides = array<i32>} : memref<2x16x256xf32, #tpu.memory_space<vmem>>, vector<1x16x256xf32>,
    return
  }
  func.func @transform_0(%arg0: i32) -> (i32, i32, i32) {
    %c0_i32 = arith.constant 0 : i32
    %c0_i32_0 = arith.constant 0 : i32
    %c0_i32_1 = arith.constant 0 : i32
    return %arg0, %c0_i32, %c0_i32_0 : i32, i32, i32
  }
  func.func @transform_1(%arg0: i32) -> (i32, i32) {
    %c0_i32 = arith.constant 0 : i32
    %c0_i32_0 = arith.constant 0 : i32
    %c0_i32_1 = arith.constant 0 : i32
    return %c0_i32, %c0_i32_0 : i32, i32
  }
  func.func @transform_2(%arg0: i32) -> (i32, i32) {
    %c0_i32 = arith.constant 0 : i32
    %c0_i32_0 = arith.constant 0 : i32
    %c0_i32_1 = arith.constant 0 : i32
    return %c0_i32, %c0_i32_0 : i32, i32
  }
  func.func @transform_3(%arg0: i32) -> (i32, i32) {
    %c0_i32 = arith.constant 0 : i32
    %c0_i32_0 = arith.constant 0 : i32
    %c0_i32_1 = arith.constant 0 : i32
    return %c0_i32, %c0_i32_0 : i32, i32
  }
  func.func @transform_4(%arg0: i32) -> (i32, i32) {
    %c0_i32 = arith.constant 0 : i32
    %c0_i32_0 = arith.constant 0 : i32
    %c0_i32_1 = arith.constant 0 : i32
    return %c0_i32, %c0_i32_0 : i32, i32
  }
  func.func @transform_5(%arg0: i32) -> (i32, i32) {
    %c0_i32 = arith.constant 0 : i32
    %c0_i32_0 = arith.constant 0 : i32
    %c0_i32_1 = arith.constant 0 : i32
    return %c0_i32, %c0_i32_0 : i32, i32
  }
  func.func @transform_6(%arg0: i32) -> (i32, i32, i32) {
    %c0_i32 = arith.constant 0 : i32
    %c0_i32_0 = arith.constant 0 : i32
    %c0_i32_1 = arith.constant 0 : i32
    return %arg0, %c0_i32, %c0_i32_0 : i32, i32, i32
  }
}

</mosaic_0001>

<bundles_post_ra>
// kernel: tpu_custom_call.1
= control target key start
LH: loop header
LB: loop body
LE: loop exit
PB: predicated region body
PF: predicated region fallthrough
CT: control target
= control target key end

     0   :  { %11 = vsyncpa [#allocation5], 0  ;;  %s2022_s0 = inlined_call_operand.hbm [shape: f32[2,16,256], index: 0, kind: input, shape index: {}]   ;;  %s2023_s1 = inlined_call_operand.vmem [shape: f32[16,144], index: 1, kind: input, shape index: {}]   ;;  %s2024_s2 = inlined_call_operand.vmem [shape: f32[16,2], index: 2, kind: input, shape index: {}]   ;;  %s2025_s3 = inlined_call_operand.vmem [shape: f32[1,2], index: 3, kind: input, shape index: {}]   ;;  %s2026_s4 = inlined_call_operand.vmem [shape: f32[16,2], index: 4, kind: input, shape index: {}]   ;;  %s2027_s5 = inlined_call_operand.vmem [shape: f32[16,1], index: 5, kind: input, shape index: {}]   ;;  %s2028_s6 = inlined_call_operand.hbm [shape: f32[2,16,256], index: 6, kind: output, shape index: {}]  }
   0x1   :  { %12 = vsyncpa [#allocation6], 0  ;;  %s1633_s21 = smov [#allocation4]   ;;  %s1585_s25 = scalar_lea.hbm %s2022_s0, 1024 }
   0x2   :  { %s18_s22 = sshll.u32 %s1633_s21, 4  ;;  %p1586_p0 = scmp.ne.s32.totalorder %s2022_s0, %s1585_s25  ;;  %s19_s22 = int_to_ptr.vmem [resolvable:$true] %s18_s22 }
   0x3   :  { %p1589_p1 = scmp.lt.u32.totalorder %s1585_s25, %s2022_s0 }
   0x5   :  { %p1591_p2 = pnand %p1589_p1, %p1586_p0 }
   0x7   :  { %1594 = shalt.err (!%p1591_p2)
}
   0x8   :  { %s1595_s30 = scalar_lea.vmem %s19_s22, 1024  ;;  %p1600_p4 = scmp.lt.s32.totalorder %s19_s22, %s19_s22 }
   0x9   :  { %p1596_p3 = scmp.ne.s32.totalorder %s19_s22, %s1595_s30  ;;  %p1601_p5 = scmp.lt.s32.totalorder %s1595_s30, %s1595_s30 }
   0xb   :  { %p1602_p6 = por %p1601_p5, %p1600_p4 }
   0xd   :  { %p1603_p7 = pnand %p1602_p6, %p1596_p3 }
   0xf   :  { %1606 = shalt.err (!%p1603_p7)
}
  0x10   :  { %s1634_s7 = smov 256   ;;  %s1635_s8 = smov 16  }
  0x11   :  { %24 = dma.hbm_to_vmem [thread:$0]  %s2022_s0, 1024, %s19_s22, [#allocation5], %s1634_s7, %s1634_s7, %s1635_s8  }
  0x12   :  { %1629 = dma.done.wait [#allocation5], 1024  }
  0x13   :  { %1630 = vsyncadd [#allocation5], 4294966272  ;;  %v1636_v0 = vmov 0.0   ;;  %s1637_s11 = smov 17   ;;  %v1696_v1 = vld [vmem:[#allocation4 + $0x20] sm:$0xff]  ;;  %v1698_v2 = vld [vmem:[#allocation4 + $0x28] sm:$0xff]  ;;  %v38_v24 = vlaneseq }
  0x14   :  { %1333 = vrot.lane.b32.xlu1 %v1636_v0, %s1637_s11  ;;  %1328 = vrot.lane.b32.xlu0 %v1636_v0, %s1637_s11  ;;  %v1700_v3 = vld [vmem:[#allocation4] sm:$0xff]  ;;  %v1347_v4 = vpack.i.bf16 %v1698_v2, %v1696_v1  ;;  %v1704_v5 = vld [vmem:[#allocation4 + $0x8] sm:$0xff]  ;;  %v1706_v6 = vld [vmem:[#allocation4 + $0x30] sm:$0xff]  ;;  %v1517_v15 = vpack.i.bf16 %v1636_v0, %v1698_v2  ;;  %s1638_s0 = smov 15   ;;  %s1639_s12 = smov 1   ;;  %vm165_vm0 = vcmask 130048  }
  0x15   :  { %v1708_v7 = vld [vmem:[#allocation4 + $0x38] sm:$0xff]  ;;  %v1337_v8 = vpack.i.bf16 %v1704_v5, %v1700_v3  ;;  %v1712_v9 = vld [vmem:[#allocation4 + $0x10] sm:$0xff]  ;;  %v1507_v13 = vpack.i.bf16 %v1636_v0, %v1704_v5  ;;  %v1532_v16 = vpack.i.bf16 %v1706_v6, %v1696_v1  ;;  %v1290_v22 = vpack.c.bf16 %v1706_v6, %v1696_v1  ;;  %s1640_s13 = smov 127   ;;  %s1641_s14 = smov 113   ;;  %v78_v23 = vld [vmem:[%s2023_s1 + $0x8] sm:$0xff] }
  0x16   :  { %v1714_v10 = vld [vmem:[#allocation4 + $0x18] sm:$0xff]  ;;  %v1352_v11 = vpack.i.bf16 %v1708_v7, %v1706_v6  ;;  %v1522_v14 = vpack.i.bf16 %v1636_v0, %v1708_v7  ;;  %v1527_v17 = vpack.i.bf16 %v1712_v9, %v1700_v3  ;;  %v1242_v20 = vpack.c.bf16 %v1712_v9, %v1700_v3  ;;  %s1642_s15 = smov 112   ;;  %s1643_s16 = smov 111   ;;  %1162 = vmatprep.mubr.msk.f32.mxu0 %vm165_vm0, %v78_v23 }
  0x17   :  { %v1342_v12 = vpack.i.bf16 %v1714_v10, %v1712_v9  ;;  %v1542_v18 = vpack.i.bf16 %v1636_v0, %v1714_v10  ;;  %v1240_v19 = vpack.c.bf16 %v1714_v10, %v1704_v5  ;;  %v1288_v21 = vpack.c.bf16 %v1708_v7, %v1698_v2  ;;  %1164 = vmatprep.mubr.msk.f32.mxu1 %vm165_vm0, %v78_v23 }
  0x18   :  { %1348 = vrot.lane.b32.xlu1 %v1347_v4, %s1637_s11  ;;  %1338 = vrot.lane.b32.xlu0 %v1337_v8, %s1637_s11  ;;  %v1748_v25 = vand.u32 127, %v38_v24  ;;  %vm124_vm1 = vcmask 138240   ;;  %vm202_vm6 = vcmask 121856   ;;  %vm243_vm11 = vcmask 7168  }
  0x19   :  { %vm292_vm12 = vcmask 1039360   ;;  %vm333_vm13 = vcmask 924672   ;;  %vm374_vm14 = vcmask 916480   ;;  %vm411_vm15 = vcmask 908288  }
  0x1a   :  { %v1751_v28 = vadd.s32 128, %v1748_v25  ;;  %v45_v31 = vand.u32 15, %v1748_v25 }
  0x1c   :  { %1353 = vrot.lane.b32.xlu1 %v1352_v11, %s1637_s11  ;;  %1343 = vrot.lane.b32.xlu0 %v1342_v12, %s1637_s11  ;;  %v52_v30 = vand.u32 15, %v1751_v28  ;;  %vm1759_vm3 = vcmp.ge.s32.totalorder %v45_v31, 1  ;;  %vm71_vm9 = vcmp.le.s32.totalorder %v45_v31, 14 }
  0x1d   :  { %vm1778_vm5 = vmpackc.low %vm1759_vm3, %vm1759_vm3 }
  0x1e   :  { %vm66_vm2 = vcmp.ge.s32.totalorder %v52_v30, 1  ;;  %vm72_vm7 = vcmp.le.s32.totalorder %v52_v30, 14  ;;  %vm1816_vm10 = vmpackc.low %vm71_vm9, %vm71_vm9 }
  0x1f   :  { %vm1766_vm4 = vmpackc.low %vm66_vm2, %vm66_vm2 }
  0x20   :  { %1363 = vrot.lane.b32.xlu1 %v1342_v12, %s1635_s8  ;;  %1358 = vrot.lane.b32.xlu0 %v1337_v8, %s1635_s8  ;;  %vm1802_vm8 = vmpackc.low %vm72_vm7, %vm72_vm7 }
  0x24   :  { %1373 = vrot.lane.b32.xlu1 %v1352_v11, %s1635_s8  ;;  %1368 = vrot.lane.b32.xlu0 %v1347_v4, %s1635_s8 }
  0x28   :  { %1383 = vrot.lane.b32.xlu1 %v1636_v0, %s1635_s8  ;;  %1378 = vrot.lane.b32.xlu0 %v1636_v0, %s1635_s8 }
  0x2c   :  { %1393 = vrot.lane.b32.xlu1 %v1342_v12, %s1638_s0  ;;  %1388 = vrot.lane.b32.xlu0 %v1337_v8, %s1638_s0 }
  0x30   :  { %1403 = vrot.lane.b32.xlu1 %v1352_v11, %s1638_s0  ;;  %1398 = vrot.lane.b32.xlu0 %v1347_v4, %s1638_s0 }
  0x34   :  { %1413 = vrot.lane.b32.xlu1 %v1636_v0, %s1638_s0  ;;  %1408 = vrot.lane.b32.xlu0 %v1636_v0, %s1638_s0 }
  0x38   :  { %1423 = vrot.lane.b32.xlu1 %v1342_v12, %s1639_s12  ;;  %1418 = vrot.lane.b32.xlu0 %v1337_v8, %s1639_s12 }
  0x3c   :  { %1433 = vrot.lane.b32.xlu1 %v1352_v11, %s1639_s12  ;;  %1428 = vrot.lane.b32.xlu0 %v1347_v4, %s1639_s12 }
  0x40   :  { %1443 = vrot.lane.b32.xlu1 %v1636_v0, %s1639_s12  ;;  %1438 = vrot.lane.b32.xlu0 %v1636_v0, %s1639_s12 }
  0x44   :  { %1453 = vrot.lane.b32.xlu1 %v1542_v18, %s1640_s13  ;;  %1448 = vrot.lane.b32.xlu0 %v1507_v13, %s1640_s13 }
  0x48   :  { %1463 = vrot.lane.b32.xlu1 %v1522_v14, %s1640_s13  ;;  %1458 = vrot.lane.b32.xlu0 %v1517_v15, %s1640_s13 }
  0x4c   :  { %1473 = vrot.lane.b32.xlu1 %v1532_v16, %s1640_s13  ;;  %1468 = vrot.lane.b32.xlu0 %v1527_v17, %s1640_s13 }
  0x50   :  { %1483 = vrot.lane.b32.xlu1 %v1542_v18, %s1641_s14  ;;  %1478 = vrot.lane.b32.xlu0 %v1507_v13, %s1641_s14 }
  0x54   :  { %1493 = vrot.lane.b32.xlu1 %v1522_v14, %s1641_s14  ;;  %1488 = vrot.lane.b32.xlu0 %v1517_v15, %s1641_s14 }
  0x58   :  { %1503 = vrot.lane.b32.xlu1 %v1532_v16, %s1641_s14  ;;  %1498 = vrot.lane.b32.xlu0 %v1527_v17, %s1641_s14 }
  0x5c   :  { %1513 = vrot.lane.b32.xlu1 %v1542_v18, %s1642_s15  ;;  %1508 = vrot.lane.b32.xlu0 %v1507_v13, %s1642_s15 }
  0x60   :  { %1523 = vrot.lane.b32.xlu1 %v1522_v14, %s1642_s15  ;;  %1518 = vrot.lane.b32.xlu0 %v1517_v15, %s1642_s15 }
  0x64   :  { %1533 = vrot.lane.b32.xlu1 %v1532_v16, %s1642_s15  ;;  %1528 = vrot.lane.b32.xlu0 %v1527_v17, %s1642_s15 }
  0x68   :  { %1543 = vrot.lane.b32.xlu1 %v1542_v18, %s1643_s16  ;;  %1538 = vrot.lane.b32.xlu0 %v1507_v13, %s1643_s16 }
  0x6c   :  { %1553 = vrot.lane.b32.xlu1 %v1522_v14, %s1643_s16  ;;  %1548 = vrot.lane.b32.xlu0 %v1517_v15, %s1643_s16 }
  0x70   :  { %1563 = vrot.lane.b32.xlu1 %v1532_v16, %s1643_s16  ;;  %1558 = vrot.lane.b32.xlu0 %v1527_v17, %s1643_s16 }
  0x86   :  { %v1334_v26 = vpop.permute.xlu1 %1333  ;;  %v1329_v27 = vpop.permute.xlu0 %1328 }
  0x87   :  { %v1335_v34 = vunpack.i.l.bf16 %v1334_v26  ;;  %v1336_v38 = vunpack.i.h.bf16 %v1334_v26  ;;  %v1330_v41 = vunpack.i.l.bf16 %v1329_v27  ;;  %v1331_v46 = vunpack.i.h.bf16 %v1329_v27 }
  0x8a   :  { %v1349_v29 = vpop.permute.xlu1 %1348  ;;  %v1339_v33 = vpop.permute.xlu0 %1338 }
  0x8b   :  { %v1351_v32 = vunpack.i.h.bf16 %v1349_v29  ;;  %v1350_v35 = vunpack.i.l.bf16 %v1349_v29  ;;  %v1341_v36 = vunpack.i.h.bf16 %v1339_v33  ;;  %v1340_v37 = vunpack.i.l.bf16 %v1339_v33 }
  0x8d   :  { %v462_v45 = vsel %vm124_vm1, %v1350_v35, %v1351_v32  ;;  %v461_v49 = vsel %vm124_vm1, %v1335_v34, %v1350_v35  ;;  %v126_v50 = vsel %vm124_vm1, %v1340_v37, %v1341_v36  ;;  %v125_v53 = vsel %vm124_vm1, %v1330_v41, %v1340_v37 }
  0x8e   :  { %v1354_v39 = vpop.permute.xlu1 %1353  ;;  %v1344_v44 = vpop.permute.xlu0 %1343 }
  0x8f   :  { %v1356_v42 = vunpack.i.h.bf16 %v1354_v39  ;;  %v1355_v43 = vunpack.i.l.bf16 %v1354_v39  ;;  %v1346_v47 = vunpack.i.h.bf16 %v1344_v44  ;;  %v1345_v48 = vunpack.i.l.bf16 %v1344_v44 }
  0x91   :  { %v464_v52 = vsel %vm124_vm1, %v1355_v43, %v1356_v42  ;;  %v463_v54 = vsel %vm124_vm1, %v1336_v38, %v1355_v43  ;;  %v128_v56 = vsel %vm124_vm1, %v1345_v48, %v1346_v47  ;;  %v127_v58 = vsel %vm124_vm1, %v1331_v46, %v1345_v48 }
  0x92   :  { %v1364_v55 = vpop.permute.xlu1 %1363  ;;  %v1266_v57 = vpack.c.bf16 %v464_v52, %v462_v45  ;;  %v1269_v60 = vpack.c.bf16 %v463_v54, %v461_v49  ;;  %v1359_v63 = vpop.permute.xlu0 %1358  ;;  %v1218_v0 = vpack.c.bf16 %v128_v56, %v126_v50  ;;  %v1221_v4 = vpack.c.bf16 %v127_v58, %v125_v53 }
  0x93   :  { %v1366_v61 = vunpack.i.h.bf16 %v1364_v55  ;;  %v1365_v62 = vunpack.i.l.bf16 %v1364_v55  ;;  %v1361_v8 = vunpack.i.h.bf16 %v1359_v63  ;;  %v1360_v11 = vunpack.i.l.bf16 %v1359_v63  ;;  %v80_v55 = vld [vmem:[%s2023_s1 + $0x18] sm:$0xff] }
  0x94   :  { %1268 = vmatprep.subr.msk.bf16.mxu1 %vm1766_vm4, %v1266_v57  ;;  %1220 = vmatprep.subr.msk.bf16.mxu0 %vm1766_vm4, %v1218_v0 }
  0x95   :  { %1271 = vmatpush1.bf16.msk.msra.mxu1 %vm1778_vm5, %v1269_v60  ;;  %v169_v12 = vsel %vm165_vm0, %v1365_v62, %v1366_v61  ;;  %1223 = vmatpush1.bf16.msk.msra.mxu0 %vm1778_vm5, %v1221_v4  ;;  %v167_v14 = vsel %vm165_vm0, %v1360_v11, %v1361_v8 }
  0x96   :  { %v1374_v13 = vpop.permute.xlu1 %1373  ;;  %v1369_v17 = vpop.permute.xlu0 %1368  ;;  %v1224_v18 = vpack.c.bf16 %v169_v12, %v167_v14 }
  0x97   :  { %v1376_v15 = vunpack.i.h.bf16 %v1374_v13  ;;  %v1375_v16 = vunpack.i.l.bf16 %v1374_v13  ;;  %v1371_v23 = vunpack.i.h.bf16 %v1369_v17  ;;  %v1370_v26 = vunpack.i.l.bf16 %v1369_v17 }
  0x98   :  { %1225 = vmatprep.subr.bf16.mxu0 %v1224_v18 }
  0x99   :  { %v504_v27 = vsel %vm165_vm0, %v1375_v16, %v1376_v15  ;;  %v502_v32 = vsel %vm165_vm0, %v1370_v26, %v1371_v23 }
  0x9a   :  { %v1384_v29 = vpop.permute.xlu1 %1383  ;;  %v1379_v35 = vpop.permute.xlu0 %1378  ;;  %v1272_v36 = vpack.c.bf16 %v504_v27, %v502_v32 }
  0x9b   :  { %v1386_v33 = vunpack.i.h.bf16 %v1384_v29  ;;  %v1385_v34 = vunpack.i.l.bf16 %v1384_v29  ;;  %v1381_v37 = vunpack.i.h.bf16 %v1379_v35  ;;  %v1380_v38 = vunpack.i.l.bf16 %v1379_v35 }
  0x9c   :  { %1273 = vmatprep.subr.bf16.mxu1 %v1272_v36 }
  0x9d   :  { %v501_v39 = vsel %vm165_vm0, %v1385_v34, %v1370_v26  ;;  %v503_v40 = vsel %vm165_vm0, %v1386_v33, %v1375_v16  ;;  %v166_v42 = vsel %vm165_vm0, %v1380_v38, %v1360_v11  ;;  %v168_v43 = vsel %vm165_vm0, %v1381_v37, %v1365_v62 }
  0x9e   :  { %v1394_v41 = vpop.permute.xlu1 %1393  ;;  %v1274_v44 = vpack.c.bf16 %v503_v40, %v501_v39  ;;  %v1389_v47 = vpop.permute.xlu0 %1388  ;;  %v1226_v48 = vpack.c.bf16 %v168_v43, %v166_v42 }
  0x9f   :  { %v1396_v45 = vunpack.i.h.bf16 %v1394_v41  ;;  %v1395_v46 = vunpack.i.l.bf16 %v1394_v41  ;;  %v1391_v49 = vunpack.i.h.bf16 %v1389_v47  ;;  %v1390_v50 = vunpack.i.l.bf16 %v1389_v47 }
  0xa0   :  { %1275 = vmatpush1.bf16.msra.mxu1 %v1274_v44  ;;  %1227 = vmatpush1.bf16.msra.mxu0 %v1226_v48 }
  0xa1   :  { %v206_v52 = vsel %vm202_vm6, %v1395_v46, %v1396_v45  ;;  %v204_v53 = vsel %vm202_vm6, %v1390_v50, %v1391_v49 }
  0xa2   :  { %v1404_v54 = vpop.permute.xlu1 %1403  ;;  %v1228_v56 = vpack.c.bf16 %v206_v52, %v204_v53  ;;  %v1399_v60 = vpop.permute.xlu0 %1398 }
  0xa3   :  { %v1406_v57 = vunpack.i.h.bf16 %v1404_v54  ;;  %v1405_v58 = vunpack.i.l.bf16 %v1404_v54  ;;  %v1401_v61 = vunpack.i.h.bf16 %v1399_v60  ;;  %v1400_v28 = vunpack.i.l.bf16 %v1399_v60 }
  0xa4   :  { %1230 = vmatprep.subr.msk.bf16.mxu0 %vm1802_vm8, %v1228_v56 }
  0xa5   :  { %v540_v30 = vsel %vm202_vm6, %v1405_v58, %v1406_v57  ;;  %v538_v62 = vsel %vm202_vm6, %v1400_v28, %v1401_v61 }
  0xa6   :  { %v1414_v63 = vpop.permute.xlu1 %1413  ;;  %v1276_v0 = vpack.c.bf16 %v540_v30, %v538_v62  ;;  %v1409_v11 = vpop.permute.xlu0 %1408 }
  0xa7   :  { %v1416_v4 = vunpack.i.h.bf16 %v1414_v63  ;;  %v1415_v8 = vunpack.i.l.bf16 %v1414_v63  ;;  %v1411_v12 = vunpack.i.h.bf16 %v1409_v11  ;;  %v1410_v13 = vunpack.i.l.bf16 %v1409_v11 }
  0xa8   :  { %1278 = vmatprep.subr.msk.bf16.mxu1 %vm1802_vm8, %v1276_v0 }
  0xa9   :  { %v537_v14 = vsel %vm202_vm6, %v1415_v8, %v1400_v28  ;;  %v539_v15 = vsel %vm202_vm6, %v1416_v4, %v1405_v58  ;;  %v205_v25 = vsel %vm202_vm6, %v1411_v12, %v1395_v46  ;;  %v203_v31 = vsel %vm202_vm6, %v1410_v13, %v1390_v50 }
  0xaa   :  { %v1279_v17 = vpack.c.bf16 %v539_v15, %v537_v14  ;;  %v1424_v18 = vpop.permute.xlu1 %1423  ;;  %v1231_v23 = vpack.c.bf16 %v205_v25, %v203_v31  ;;  %v1419_v29 = vpop.permute.xlu0 %1418 }
  0xab   :  { %v1426_v26 = vunpack.i.h.bf16 %v1424_v18  ;;  %v1425_v27 = vunpack.i.l.bf16 %v1424_v18  ;;  %v1421_v32 = vunpack.i.h.bf16 %v1419_v29  ;;  %v1420_v33 = vunpack.i.l.bf16 %v1419_v29 }
  0xac   :  { %1281 = vmatpush1.bf16.msk.msra.mxu1 %vm1816_vm10, %v1279_v17  ;;  %1233 = vmatpush1.bf16.msk.msra.mxu0 %vm1816_vm10, %v1231_v23 }
  0xad   :  { %v247_v34 = vsel %vm243_vm11, %v1425_v27, %v1426_v26  ;;  %v245_v35 = vsel %vm243_vm11, %v1420_v33, %v1421_v32 }
  0xae   :  { %v1434_v36 = vpop.permute.xlu1 %1433  ;;  %v1234_v37 = vpack.c.bf16 %v247_v34, %v245_v35  ;;  %v1429_v40 = vpop.permute.xlu0 %1428 }
  0xaf   :  { %v1436_v38 = vunpack.i.h.bf16 %v1434_v36  ;;  %v1435_v39 = vunpack.i.l.bf16 %v1434_v36  ;;  %v1431_v41 = vunpack.i.h.bf16 %v1429_v40  ;;  %v1430_v42 = vunpack.i.l.bf16 %v1429_v40 }
  0xb0   :  { %1236 = vmatprep.subr.msk.bf16.mxu0 %vm1766_vm4, %v1234_v37 }
  0xb1   :  { %v580_v43 = vsel %vm243_vm11, %v1435_v39, %v1436_v38  ;;  %v578_v44 = vsel %vm243_vm11, %v1430_v42, %v1431_v41 }
  0xb2   :  { %v1444_v45 = vpop.permute.xlu1 %1443  ;;  %v1282_v46 = vpack.c.bf16 %v580_v43, %v578_v44  ;;  %v1439_v49 = vpop.permute.xlu0 %1438 }
  0xb3   :  { %v1446_v47 = vunpack.i.h.bf16 %v1444_v45  ;;  %v1445_v48 = vunpack.i.l.bf16 %v1444_v45  ;;  %v1441_v50 = vunpack.i.h.bf16 %v1439_v49  ;;  %v1440_v52 = vunpack.i.l.bf16 %v1439_v49 }
  0xb4   :  { %1284 = vmatprep.subr.msk.bf16.mxu1 %vm1766_vm4, %v1282_v46 }
  0xb5   :  { %v577_v53 = vsel %vm243_vm11, %v1445_v48, %v1430_v42  ;;  %v579_v54 = vsel %vm243_vm11, %v1446_v47, %v1435_v39  ;;  %v246_v57 = vsel %vm243_vm11, %v1441_v50, %v1425_v27  ;;  %v244_v58 = vsel %vm243_vm11, %v1440_v52, %v1420_v33 }
  0xb6   :  { %v1285_v56 = vpack.c.bf16 %v579_v54, %v577_v53  ;;  %v1454_v60 = vpop.permute.xlu1 %1453  ;;  %v1237_v61 = vpack.c.bf16 %v246_v57, %v244_v58  ;;  %v1449_v62 = vpop.permute.xlu0 %1448 }
  0xb7   :  { %v1456_v28 = vunpack.i.h.bf16 %v1454_v60  ;;  %v1455_v30 = vunpack.i.l.bf16 %v1454_v60  ;;  %v1451_v63 = vunpack.i.h.bf16 %v1449_v62  ;;  %v1450_v0 = vunpack.i.l.bf16 %v1449_v62 }
  0xb8   :  { %1287 = vmatpush1.bf16.msk.msra.mxu1 %vm1778_vm5, %v1285_v56  ;;  %1239 = vmatpush1.bf16.msk.msra.mxu0 %vm1778_vm5, %v1237_v61 }
  0xb9   :  { %v296_v4 = vsel %vm292_vm12, %v1455_v30, %v1456_v28  ;;  %1289 = vmatprep.subr.bf16.mxu1 %v1288_v21  ;;  %v294_v8 = vsel %vm292_vm12, %v1450_v0, %v1451_v63  ;;  %1241 = vmatprep.subr.bf16.mxu0 %v1240_v19 }
  0xba   :  { %v1464_v11 = vpop.permute.xlu1 %1463  ;;  %v1244_v12 = vpack.c.bf16 %v296_v4, %v294_v8  ;;  %v1459_v15 = vpop.permute.xlu0 %1458 }
  0xbb   :  { %v1466_v13 = vunpack.i.h.bf16 %v1464_v11  ;;  %v1465_v14 = vunpack.i.l.bf16 %v1464_v11  ;;  %v1461_v17 = vunpack.i.h.bf16 %v1459_v15  ;;  %v1460_v25 = vunpack.i.l.bf16 %v1459_v15 }
  0xbc   :  { %1291 = vmatpush1.bf16.msra.mxu1 %v1290_v22  ;;  %1243 = vmatpush1.bf16.msra.mxu0 %v1242_v20 }
  0xbd   :  { %v628_v2 = vsel %vm292_vm12, %v1465_v14, %v1466_v13  ;;  %v626_v7 = vsel %vm292_vm12, %v1460_v25, %v1461_v17  ;;  %1246 = vmatprep.subr.msk.bf16.mxu0 %vm1802_vm8, %v1244_v12 }
  0xbe   :  { %v1474_v5 = vpop.permute.xlu1 %1473  ;;  %v1292_v10 = vpack.c.bf16 %v628_v2, %v626_v7  ;;  %v1469_v31 = vpop.permute.xlu0 %1468 }
  0xbf   :  { %v1476_v19 = vunpack.i.h.bf16 %v1474_v5  ;;  %v1475_v21 = vunpack.i.l.bf16 %v1474_v5  ;;  %v1471_v18 = vunpack.i.h.bf16 %v1469_v31  ;;  %v1470_v23 = vunpack.i.l.bf16 %v1469_v31 }
  0xc0   :  { %1294 = vmatprep.subr.msk.bf16.mxu1 %vm1802_vm8, %v1292_v10 }
  0xc1   :  { %v625_v1 = vsel %vm292_vm12, %v1475_v21, %v1460_v25  ;;  %v627_v6 = vsel %vm292_vm12, %v1476_v19, %v1465_v14  ;;  %v295_v9 = vsel %vm292_vm12, %v1471_v18, %v1455_v30  ;;  %v293_v20 = vsel %vm292_vm12, %v1470_v23, %v1450_v0 }
  0xc2   :  { %v1295_v3 = vpack.c.bf16 %v627_v6, %v625_v1  ;;  %v1484_v22 = vpop.permute.xlu1 %1483  ;;  %v1247_v26 = vpack.c.bf16 %v295_v9, %v293_v20  ;;  %v1479_v32 = vpop.permute.xlu0 %1478 }
  0xc3   :  { %v1486_v27 = vunpack.i.h.bf16 %v1484_v22  ;;  %v1485_v29 = vunpack.i.l.bf16 %v1484_v22  ;;  %v1481_v33 = vunpack.i.h.bf16 %v1479_v32  ;;  %v1480_v34 = vunpack.i.l.bf16 %v1479_v32 }
  0xc4   :  { %1297 = vmatpush1.bf16.msk.msra.mxu1 %vm1816_vm10, %v1295_v3  ;;  %1249 = vmatpush1.bf16.msk.msra.mxu0 %vm1816_vm10, %v1247_v26 }
  0xc5   :  { %v337_v35 = vsel %vm333_vm13, %v1485_v29, %v1486_v27  ;;  %v335_v36 = vsel %vm333_vm13, %v1480_v34, %v1481_v33 }
  0xc6   :  { %v1494_v37 = vpop.permute.xlu1 %1493  ;;  %v1250_v38 = vpack.c.bf16 %v337_v35, %v335_v36  ;;  %v1489_v41 = vpop.permute.xlu0 %1488 }
  0xc7   :  { %v1496_v39 = vunpack.i.h.bf16 %v1494_v37  ;;  %v1495_v40 = vunpack.i.l.bf16 %v1494_v37  ;;  %v1491_v42 = vunpack.i.h.bf16 %v1489_v41  ;;  %v1490_v43 = vunpack.i.l.bf16 %v1489_v41 }
  0xc8   :  { %1252 = vmatprep.subr.msk.bf16.mxu0 %vm1766_vm4, %v1250_v38 }
  0xc9   :  { %v668_v44 = vsel %vm333_vm13, %v1495_v40, %v1496_v39  ;;  %v666_v45 = vsel %vm333_vm13, %v1490_v43, %v1491_v42 }
  0xca   :  { %v1504_v46 = vpop.permute.xlu1 %1503  ;;  %v1298_v47 = vpack.c.bf16 %v668_v44, %v666_v45  ;;  %v1499_v50 = vpop.permute.xlu0 %1498 }
  0xcb   :  { %v1506_v48 = vunpack.i.h.bf16 %v1504_v46  ;;  %v1505_v49 = vunpack.i.l.bf16 %v1504_v46  ;;  %v1501_v52 = vunpack.i.h.bf16 %v1499_v50  ;;  %v1500_v53 = vunpack.i.l.bf16 %v1499_v50 }
  0xcc   :  { %1300 = vmatprep.subr.msk.bf16.mxu1 %vm1766_vm4, %v1298_v47 }
  0xcd   :  { %v665_v54 = vsel %vm333_vm13, %v1505_v49, %v1490_v43  ;;  %v667_v56 = vsel %vm333_vm13, %v1506_v48, %v1495_v40  ;;  %v336_v58 = vsel %vm333_vm13, %v1501_v52, %v1485_v29  ;;  %v334_v60 = vsel %vm333_vm13, %v1500_v53, %v1480_v34 }
  0xce   :  { %v1301_v57 = vpack.c.bf16 %v667_v56, %v665_v54  ;;  %v1514_v61 = vpop.permute.xlu1 %1513  ;;  %v1253_v28 = vpack.c.bf16 %v336_v58, %v334_v60  ;;  %v1509_v63 = vpop.permute.xlu0 %1508 }
  0xcf   :  { %v1516_v30 = vunpack.i.h.bf16 %v1514_v61  ;;  %v1515_v62 = vunpack.i.l.bf16 %v1514_v61  ;;  %v1511_v0 = vunpack.i.h.bf16 %v1509_v63  ;;  %v1510_v4 = vunpack.i.l.bf16 %v1509_v63  ;;  %v77_v61 = vld [vmem:[%s2023_s1] sm:$0xff] }
  0xd0   :  { %1303 = vmatpush1.bf16.msk.msra.mxu1 %vm1778_vm5, %v1301_v57  ;;  %1255 = vmatpush1.bf16.msk.msra.mxu0 %vm1778_vm5, %v1253_v28  ;;  %v79_v28 = vld [vmem:[%s2023_s1 + $0x10] sm:$0xff] }
  0xd1   :  { %v378_v51 = vsel %vm374_vm14, %v1515_v62, %v1516_v30  ;;  %v376_v11 = vsel %vm374_vm14, %v1510_v4, %v1511_v0 }
  0xd2   :  { %v1524_v8 = vpop.permute.xlu1 %1523  ;;  %v1519_v14 = vpop.permute.xlu0 %1518  ;;  %v1256_v15 = vpack.c.bf16 %v378_v51, %v376_v11 }
  0xd3   :  { %v1526_v12 = vunpack.i.h.bf16 %v1524_v8  ;;  %v1525_v13 = vunpack.i.l.bf16 %v1524_v8  ;;  %v1521_v17 = vunpack.i.h.bf16 %v1519_v14  ;;  %v1520_v25 = vunpack.i.l.bf16 %v1519_v14 }
  0xd4   :  { %1257 = vmatprep.subr.bf16.mxu0 %v1256_v15 }
  0xd5   :  { %v708_v2 = vsel %vm374_vm14, %v1525_v13, %v1526_v12  ;;  %v706_v5 = vsel %vm374_vm14, %v1520_v25, %v1521_v17 }
  0xd6   :  { %v1534_v7 = vpop.permute.xlu1 %1533  ;;  %v1529_v19 = vpop.permute.xlu0 %1528  ;;  %v1304_v21 = vpack.c.bf16 %v708_v2, %v706_v5 }
  0xd7   :  { %v1536_v10 = vunpack.i.h.bf16 %v1534_v7  ;;  %v1535_v59 = vunpack.i.l.bf16 %v1534_v7  ;;  %v1531_v31 = vunpack.i.h.bf16 %v1529_v19  ;;  %v1530_v18 = vunpack.i.l.bf16 %v1529_v19 }
  0xd8   :  { %1305 = vmatprep.subr.bf16.mxu1 %v1304_v21 }
  0xd9   :  { %v705_v23 = vsel %vm374_vm14, %v1535_v59, %v1520_v25  ;;  %v707_v1 = vsel %vm374_vm14, %v1536_v10, %v1525_v13  ;;  %v375_v3 = vsel %vm374_vm14, %v1530_v18, %v1510_v4  ;;  %v377_v9 = vsel %vm374_vm14, %v1531_v31, %v1515_v62  ;;  %v81_v31 = vld [vmem:[%s2024_s2] sm:$0xff] }
  0xda   :  { %v1544_v6 = vpop.permute.xlu1 %1543  ;;  %v1306_v20 = vpack.c.bf16 %v707_v1, %v705_v23  ;;  %v1539_v27 = vpop.permute.xlu0 %1538  ;;  %v1258_v29 = vpack.c.bf16 %v377_v9, %v375_v3  ;;  %v82_v23 = vld [vmem:[%s2024_s2 + $0x8] sm:$0xff] }
  0xdb   :  { %v1546_v22 = vunpack.i.h.bf16 %v1544_v6  ;;  %v1545_v26 = vunpack.i.l.bf16 %v1544_v6  ;;  %v1541_v32 = vunpack.i.h.bf16 %v1539_v27  ;;  %v1540_v33 = vunpack.i.l.bf16 %v1539_v27 }
  0xdc   :  { %1307 = vmatpush1.bf16.msra.mxu1 %v1306_v20  ;;  %1259 = vmatpush1.bf16.msra.mxu0 %v1258_v29 }
  0xdd   :  { %v415_v34 = vsel %vm411_vm15, %v1545_v26, %v1546_v22  ;;  %v413_v35 = vsel %vm411_vm15, %v1540_v33, %v1541_v32 }
  0xde   :  { %v1554_v36 = vpop.permute.xlu1 %1553  ;;  %v1260_v37 = vpack.c.bf16 %v415_v34, %v413_v35  ;;  %v1549_v40 = vpop.permute.xlu0 %1548 }
  0xdf   :  { %v1556_v38 = vunpack.i.h.bf16 %v1554_v36  ;;  %v1555_v39 = vunpack.i.l.bf16 %v1554_v36  ;;  %v1551_v41 = vunpack.i.h.bf16 %v1549_v40  ;;  %v1550_v42 = vunpack.i.l.bf16 %v1549_v40 }
  0xe0   :  { %1262 = vmatprep.subr.msk.bf16.mxu0 %vm1802_vm8, %v1260_v37 }
  0xe1   :  { %v744_v43 = vsel %vm411_vm15, %v1555_v39, %v1556_v38  ;;  %v742_v44 = vsel %vm411_vm15, %v1550_v42, %v1551_v41 }
  0xe2   :  { %v1564_v45 = vpop.permute.xlu1 %1563  ;;  %v1308_v46 = vpack.c.bf16 %v744_v43, %v742_v44  ;;  %v1559_v49 = vpop.permute.xlu0 %1558 }
  0xe3   :  { %v1566_v47 = vunpack.i.h.bf16 %v1564_v45  ;;  %v1565_v48 = vunpack.i.l.bf16 %v1564_v45  ;;  %v1561_v50 = vunpack.i.h.bf16 %v1559_v49  ;;  %v1560_v52 = vunpack.i.l.bf16 %v1559_v49 }
  0xe4   :  { %1310 = vmatprep.subr.msk.bf16.mxu1 %vm1802_vm8, %v1308_v46  ;;  %v1020_v46 = vshrl.u32 %v38_v24, 7 }
  0xe5   :  { %v741_v53 = vsel %vm411_vm15, %v1565_v48, %v1550_v42  ;;  %v743_v54 = vsel %vm411_vm15, %v1566_v47, %v1555_v39  ;;  %v414_v57 = vsel %vm411_vm15, %v1561_v50, %v1545_v26  ;;  %v412_v58 = vsel %vm411_vm15, %v1560_v52, %v1540_v33  ;;  %v85_v47 = vld [vmem:[%s2025_s3] sm:$0x1] }
  0xe6   :  { %v1311_v56 = vpack.c.bf16 %v743_v54, %v741_v53  ;;  %v1263_v60 = vpack.c.bf16 %v414_v57, %v412_v58  ;;  %v1021_v52 = vsub.s32 0, %v1020_v46  ;;  %v84_v57 = vld [vmem:[%s2026_s4 + $0x8] sm:$0xff]  ;;  %v83_v58 = vld [vmem:[%s2026_s4] sm:$0xff] }
  0xe8   :  { %1313 = vmatpush1.bf16.msk.msra.mxu1 %vm1816_vm10, %v1311_v56  ;;  %1265 = vmatpush1.bf16.msk.msra.mxu0 %vm1816_vm10, %v1263_v60 }
  0xeb   :  { %977 = vmatmul.mubr.f32.vlgmr.msra.gmra.mrb[0].mxu1 %v77_v61  ;;  %900 = vmatmul.mubr.f32.vlgmr.msra.gmra.mrb[0].mxu0 %v77_v61 }
  0xec   :  { %1165 = vmatprep.mubr.msk.f32.mxu1 %vm165_vm0, %v80_v55  ;;  %1163 = vmatprep.mubr.msk.f32.mxu0 %vm165_vm0, %v80_v55  ;;  %vm1007_vm0 = vcmask 15360  }
  0xef   :  { %983 = vmatmul.mubr.f32.gmra.mrb[2].mxu1 %v79_v28  ;;  %906 = vmatmul.mubr.f32.gmra.mrb[2].mxu0 %v79_v28 }
 0x1be   :  { %v1921_v16 = vpop.f32.mrb[0].mxu1  ;;  %v1923_v30 = vpop.f32.mrb[0].mxu0 }
 0x1bf   :  { %v1925_v62 = vpop.f32.mrb[1].mxu1  ;;  %v989_v63 = vmax.f32 %v1923_v30, 0.0  ;;  %v1928_v0 = vpop.f32.mrb[1].mxu0  ;;  %v991_v51 = vmax.f32 %v1921_v16, 0.0 }
 0x1c0   :  { %v990_v4 = vmax.f32 %v1928_v0, 0.0  ;;  %v992_v8 = vmax.f32 %v1925_v62, 0.0 }
 0x1c2   :  { %v1933_v11 = vpop.f32.mrb[2].mxu1  ;;  %v1935_v12 = vpop.f32.mrb[2].mxu0  ;;  %v997_v13 = vadd.f32 %v990_v4, %v989_v63  ;;  %v1071_v5 = vadd.f32 %v992_v8, %v991_v51 }
 0x1c3   :  { %v1941_v14 = vpop.f32.mrb[3].mxu1  ;;  %v993_v15 = vmax.f32 %v1935_v12, 0.0  ;;  %v1944_v17 = vpop.f32.mrb[3].mxu0  ;;  %v995_v2 = vmax.f32 %v1933_v11, 0.0  ;;  %v1118_v12 = vld [vmem:[#allocation4 + $0x20] sm:$0xff] }
 0x1c4   :  { %v994_v25 = vmax.f32 %v1944_v17, 0.0  ;;  %998 = vadd.xlane.f32.xlu0 %v997_v13  ;;  %v996_v7 = vmax.f32 %v1941_v14, 0.0 }
 0x1c6   :  { %v1000_v10 = vadd.f32 %v994_v25, %v993_v15  ;;  %v1074_v59 = vadd.f32 %v996_v7, %v995_v2 }
 0x1c8   :  { %1072 = vadd.xlane.f32.xlu0 %v1071_v5  ;;  %1001 = vadd.xlane.f32.xlu1 %v1000_v10 }
 0x1cc   :  { %1075 = vadd.xlane.f32.xlu0 %v1074_v59 }
 0x251   :  { %v999_v19 = vpop.xlane.xlu0 %998 }
 0x252   :  { %v1003_v21 = vmul.f32 0.00390625, %v999_v19 }
 0x254   :  { %v1005_v6 = vmul.f32 %v1003_v21, %v81_v31 }
 0x255   :  { %v1073_v18 = vpop.xlane.xlu0 %1072  ;;  %v1002_v1 = vpop.xlane.xlu1 %1001 }
 0x256   :  { %v1077_v3 = vmul.f32 0.00390625, %v1073_v18  ;;  %v1004_v9 = vmul.f32 0.00390625, %v1002_v1  ;;  %v1008_v26 = vsel %vm1007_vm0, %v1005_v6, 0.0  ;;  %v1644_v18 = vmov 0   ;;  %v86_v1 = vld [vmem:[%s2027_s5] sm:$0xff] }
 0x257   :  { %1568 = vset.pattern.permute.xlu0 %v1644_v18  ;;  %1567 = vset.pattern.permute.xlu1 %v1644_v18 }
 0x258   :  { %v1006_v20 = vmul.f32 %v1004_v9, %v82_v23  ;;  %v1079_v27 = vmul.f32 %v1077_v3, %v81_v31 }
 0x259   :  { %v1076_v22 = vpop.xlane.xlu0 %1075 }
 0x25a   :  { %v1009_v29 = vsel %vm1007_vm0, %v1006_v20, 0.0  ;;  %v1078_v32 = vmul.f32 0.00390625, %v1076_v22  ;;  %v1081_v36 = vsel %vm1007_vm0, %v1079_v27, 0.0 }
 0x25b   :  { %v1010_v33 = vadd.f32 %v1009_v29, %v1008_v26 }
 0x25c   :  { %v1080_v34 = vmul.f32 %v1078_v32, %v82_v23  ;;  %v87_v23 = vld [vmem:[%s2027_s5 + $0x8] sm:$0xff]  ;;  %s1645_s5 = smov [#allocation7]  }
 0x25d   :  { %v1011_v35 = vrot.slane %v1010_v33, 4  ;;  %s1150_s12 = sshll.u32 %s1645_s5, 4  ;;  %s1151_s12 = int_to_ptr.vmem [resolvable:$true] %s1150_s12 }
 0x25e   :  { %v1082_v37 = vsel %vm1007_vm0, %v1080_v34, 0.0  ;;  %s1607_s13 = scalar_lea.vmem %s1151_s12, 1024  ;;  %p1612_p9 = scmp.lt.s32.totalorder %s1151_s12, %s1151_s12 }
 0x25f   :  { %v1012_v38 = vadd.f32 %v1011_v35, %v1010_v33  ;;  %v1083_v39 = vadd.f32 %v1082_v37, %v1081_v36  ;;  %p1608_p8 = scmp.ne.s32.totalorder %s1151_s12, %s1607_s13  ;;  %p1613_p10 = scmp.lt.s32.totalorder %s1607_s13, %s1607_s13 }
 0x261   :  { %v1013_v40 = vrot.slane %v1012_v38, 2  ;;  %v1084_v41 = vrot.slane %v1083_v39, 4  ;;  %p1614_p11 = por %p1613_p10, %p1612_p9 }
 0x263   :  { %v1014_v42 = vadd.f32 %v1013_v40, %v1012_v38  ;;  %v1085_v43 = vadd.f32 %v1084_v41, %v1083_v39  ;;  %p1615_p12 = pnand %p1614_p11, %p1608_p8 }
 0x265   :  { %v1086_v44 = vrot.slane %v1085_v43, 2  ;;  %v1015_v45 = vrot.slane %v1014_v42, 1 }
 0x267   :  { %v1087_v48 = vadd.f32 %v1086_v44, %v1085_v43  ;;  %v1016_v49 = vadd.f32 %v1015_v45, %v1014_v42 }
 0x269   :  { %v1017_v50 = vadd.f32 %v1016_v49, %v85_v47  ;;  %v1088_v53 = vrot.slane %v1087_v48, 1  ;;  %v1048_v49 = vld [vmem:[#allocation4 + $0x18] sm:$0xff] }
 0x26b   :  { %v1018_v54 = vmax.f32 %v1017_v50, 0.0  ;;  %v1089_v56 = vadd.f32 %v1088_v53, %v1087_v48  ;;  %v1047_v48 = vld [vmem:[#allocation4 + $0x10] sm:$0xff] }
 0x26d   :  { %v1022_v24 = vrot.slane %v1018_v54, %v1021_v52  ;;  %v1090_v60 = vadd.f32 %v1089_v56, %v85_v47  ;;  %v1045_v54 = vld [vmem:[#allocation4] sm:$0xff]  ;;  %v1046_v56 = vld [vmem:[#allocation4 + $0x8] sm:$0xff] }
 0x26f   :  { %v1024_v61 = vmul.f32 %v1022_v24, %v84_v57  ;;  %v1023_v55 = vmul.f32 %v1022_v24, %v83_v58  ;;  %v1091_v28 = vmax.f32 %v1090_v60, 0.0 }
 0x271   :  { %v1028_v13 = vsel %vm1007_vm0, %v1024_v61, 0.0  ;;  %v1025_v5 = vsel %vm1007_vm0, %v1023_v55, 0.0  ;;  %v1095_v10 = vrot.slane %v1091_v28, %v1021_v52 }
 0x272   :  { %1029 = vadd.xlane.f32.xlu0 %v1028_v13  ;;  %1026 = vadd.xlane.f32.xlu1 %v1025_v5 }
 0x273   :  { %v1097_v59 = vmul.f32 %v1095_v10, %v84_v57  ;;  %v1096_v19 = vmul.f32 %v1095_v10, %v83_v58 }
 0x275   :  { %v1101_v21 = vsel %vm1007_vm0, %v1097_v59, 0.0  ;;  %v1098_v31 = vsel %vm1007_vm0, %v1096_v19, 0.0 }
 0x276   :  { %1102 = vadd.xlane.f32.xlu0 %v1101_v21  ;;  %1099 = vadd.xlane.f32.xlu1 %v1098_v31 }
 0x2ff   :  { %v1030_v6 = vpop.xlane.xlu0 %1029  ;;  %v1027_v3 = vpop.xlane.xlu1 %1026 }
 0x300   :  { %v1032_v9 = vadd.f32 %v1030_v6, %v87_v23  ;;  %v1031_v20 = vadd.f32 %v1027_v3, %v86_v1 }
 0x302   :  { %v1167_v22 = vmul.f32 -1.442695, %v1032_v9  ;;  %v1166_v26 = vmul.f32 -1.442695, %v1031_v20 }
 0x303   :  { %v1103_v27 = vpop.xlane.xlu0 %1102  ;;  %v1100_v29 = vpop.xlane.xlu1 %1099 }
 0x304   :  { %1569 = vpow2.f32 %v1167_v22  ;;  %v1105_v32 = vadd.f32 %v1103_v27, %v87_v23  ;;  %v1104_v33 = vadd.f32 %v1100_v29, %v86_v1 }
 0x305   :  { %1571 = vpow2.f32 %v1166_v26 }
 0x306   :  { %v1169_v34 = vmul.f32 -1.442695, %v1105_v32  ;;  %v1168_v35 = vmul.f32 -1.442695, %v1104_v33 }
 0x308   :  { %1573 = vpow2.f32 %v1169_v34 }
 0x309   :  { %1575 = vpow2.f32 %v1168_v35 }
 0x30e   :  { %v1570_v36 = vpop.eup %1569 }
 0x30f   :  { %v1572_v37 = vpop.eup %1571  ;;  %v1040_v38 = vadd.f32 1.0, %v1570_v36 }
 0x310   :  { %v1039_v39 = vadd.f32 1.0, %v1572_v37 }
 0x311   :  { %1577 = vrcp.f32 %v1040_v38 }
 0x312   :  { %v1574_v40 = vpop.eup %1573  ;;  %1579 = vrcp.f32 %v1039_v39 }
 0x313   :  { %v1576_v41 = vpop.eup %1575  ;;  %v1113_v43 = vadd.f32 1.0, %v1574_v40 }
 0x314   :  { %v1112_v42 = vadd.f32 1.0, %v1576_v41 }
 0x316   :  { %1581 = vrcp.f32 %v1112_v42 }
 0x317   :  { %1583 = vrcp.f32 %v1113_v43 }
 0x31b   :  { %v1578_v44 = vpop.eup %1577 }
 0x31c   :  { %v1580_v45 = vpop.eup %1579  ;;  %1056 = vperm.xlu0 %1568, %v1578_v44  }
 0x31d   :  { %1051 = vperm.xlu1 %1567, %v1580_v45  }
 0x320   :  { %v1582_v46 = vpop.eup %1581 }
 0x321   :  { %1124 = vperm.xlu1 %1567, %v1582_v46   ;;  %v1584_v47 = vpop.eup %1583 }
 0x325   :  { %1129 = vperm.xlu1 %1567, %v1584_v47  }
 0x39b   :  { %v1057_v50 = vpop.permute.xlu0 %1056 }
 0x39c   :  { %v1061_v52 = vmul.f32 %v1057_v50, %v993_v15  ;;  %v1062_v53 = vmul.f32 %v1057_v50, %v994_v25  ;;  %v1052_v57 = vpop.permute.xlu1 %1051  ;;  %v1119_v15 = vld [vmem:[#allocation4 + $0x28] sm:$0xff]  ;;  %v1121_v25 = vld [vmem:[#allocation4 + $0x38] sm:$0xff] }
 0x39d   :  { %v1059_v58 = vmul.f32 %v1052_v57, %v989_v63  ;;  %v1060_v24 = vmul.f32 %v1052_v57, %v990_v4  ;;  %v1120_v4 = vld [vmem:[#allocation4 + $0x30] sm:$0xff] }
 0x39e   :  { %v1065_v60 = vadd.f32 %v1061_v52, %v1047_v48  ;;  %v1066_v61 = vadd.f32 %v1062_v53, %v1048_v49 }
 0x39f   :  { %v1063_v55 = vadd.f32 %v1059_v58, %v1045_v54  ;;  %v1064_v28 = vadd.f32 %v1060_v24, %v1046_v56 }
 0x3a0   :  { %1069 = vst [vmem:[#allocation7 + $0x10] sm:$0xff] %v1065_v60  ;;  %1070 = vst [vmem:[#allocation7 + $0x18] sm:$0xff] %v1066_v61  ;;  %v1125_v13 = vpop.permute.xlu1 %1124 }
 0x3a1   :  { %1067 = vst [vmem:[#allocation7] sm:$0xff] %v1063_v55  ;;  %1068 = vst [vmem:[#allocation7 + $0x8] sm:$0xff] %v1064_v28  ;;  %v1132_v17 = vmul.f32 %v1125_v13, %v991_v51  ;;  %v1133_v30 = vmul.f32 %v1125_v13, %v992_v8 }
 0x3a3   :  { %v1136_v63 = vadd.f32 %v1132_v17, %v1118_v12  ;;  %v1137_v0 = vadd.f32 %v1133_v30, %v1119_v15 }
 0x3a4   :  { %v1130_v5 = vpop.permute.xlu1 %1129 }
 0x3a5   :  { %1141 = vst [vmem:[#allocation7 + $0x20] sm:$0xff] %v1136_v63  ;;  %1142 = vst [vmem:[#allocation7 + $0x28] sm:$0xff] %v1137_v0  ;;  %v1134_v10 = vmul.f32 %v1130_v5, %v995_v2  ;;  %v1135_v59 = vmul.f32 %v1130_v5, %v996_v7 }
 0x3a7   :  { %v1138_v16 = vadd.f32 %v1134_v10, %v1120_v4  ;;  %v1139_v51 = vadd.f32 %v1135_v59, %v1121_v25 }
 0x3a9   :  { %1143 = vst [vmem:[#allocation7 + $0x30] sm:$0xff] %v1138_v16  ;;  %1144 = vst [vmem:[#allocation7 + $0x38] sm:$0xff] %v1139_v51 }
 0x3aa   :  { %1618 = shalt.err (!%p1615_p12)
}
 0x3ab   :  { %s1619_s16 = scalar_lea.hbm %s2028_s6, 1024 }
 0x3ac   :  { %p1620_p13 = scmp.ne.s32.totalorder %s2028_s6, %s1619_s16  ;;  %p1623_p0 = scmp.lt.u32.totalorder %s1619_s16, %s2028_s6 }
 0x3ae   :  { %p1625_p1 = pnand %p1623_p0, %p1620_p13 }
 0x3b0   :  { %1628 = shalt.err (!%p1625_p1)
}
 0x3b1   :  { %1156 = dma.vmem_to_hbm [thread:$0]  %s1151_s12, 1024, %s2028_s6, [#allocation6], %s1634_s7, %s1634_s7, %s1635_s8  }
 0x3b2   :  { %1631 = dma.done.wait [#allocation6], 1024  }
 0x3b3   :  { %1632 = vsyncadd [#allocation6], 4294966272 }
 0x3b4   :  { %1160 = vsyncpa [#allocation5], 1 }
 0x3b5   :  { %1161 = vsyncpa [#allocation6], 1 }

</bundles_post_ra>
